<compile_context>
chip_gen: v6e
topology: v6e:2x2x1
jax: 0.10.0
libtpu: 0.0.40
codegen_flags: <defaults>
</compile_context>

<pallas_src>
import functools
import math

import jax
import jax.numpy as jnp
from jax.experimental import pallas as pl
from jax.experimental.pallas import tpu as pltpu

_LOG_EPS_LO = math.log(1e-8)          # log(clip lower bound)
_LOG_EPS_HI = math.log(1.0 - 1e-8)    # log(clip upper bound)


def _focal_loss_kernel(logit_ref, target_ref, cw_ref, out_ref, *, gamma):
    """One batch tile -> per-row focal loss.

    logit_ref : (TB, C)  caller dtype (f32/bf16), upcast to f32 in-kernel
    target_ref: (TB, 1)  int32
    cw_ref    : (1,  C)  f32 class weights (resident across grid steps)
    out_ref   : (TB, 1)  f32 per-row loss
    """
    logits = logit_ref[...].astype(jnp.float32)
    tgt = target_ref[...]                               # (TB, 1) int32
    cw = cw_ref[...].astype(jnp.float32)                # (1, C)

    # One-hot select of the target class (replaces scatter_/gather).
    cols = jax.lax.broadcasted_iota(jnp.int32, logits.shape, 1)  # (TB, C)
    select = (cols == tgt).astype(jnp.float32)                   # (TB, C)

    # Log-softmax form: avoids a full (TB, C) divide and is numerically stable.
    m = jnp.max(logits, axis=1, keepdims=True)                   # (TB, 1)
    shifted = logits - m
    sum_exp = jnp.sum(jnp.exp(shifted), axis=1, keepdims=True)   # (TB, 1)
    logit_t = jnp.sum(shifted * select, axis=1, keepdims=True)   # (TB, 1)
    logp_t = logit_t - jnp.log(sum_exp)

    # clamp(p_t, 1e-8, 1-1e-8) applied in log space (same semantics as reference).
    logp_t = jnp.clip(logp_t, _LOG_EPS_LO, _LOG_EPS_HI)
    p_t = jnp.exp(logp_t)

    w_t = jnp.sum(cw * select, axis=1, keepdims=True)            # (TB, 1)

    one_minus = 1.0 - p_t
    g = float(gamma)
    if g == round(g):
        pow_term = jax.lax.integer_pow(one_minus, int(round(g)))  # VPU multiplies
    else:
        pow_term = jnp.power(one_minus, jnp.float32(g))           # general gamma

    out_ref[...] = -w_t * pow_term * logp_t


def _choose_block_rows(B, C, dtype, budget_bytes=4 * 1024 * 1024):
    """Largest batch tile whose logits block is ~budget_bytes (double-buffered ->
    2x that), comfortably under the default scoped VMEM on v5e/v6e/v7x."""
    itemsize = jnp.dtype(dtype).itemsize
    rows = budget_bytes // max(1, C * itemsize)
    rows = max(16, (rows // 16) * 16)   # multiple of 16: safe for bf16 (16,128) tiling
    rows = min(rows, 2048)
    if B <= rows:
        return B                        # single full-extent block
    return rows


def focal_loss(logit, target, class_weight=None, *, gamma=2, size_average=True,
               block_rows=None):
    """Focal loss matching the PyTorch reference (type='softmax')."""
    logit = jnp.asarray(logit)          # keep caller dtype (bf16 halves HBM traffic)
    B, C = logit.shape
    if class_weight is None:
        class_weight = jnp.ones((C,), dtype=jnp.float32)
    class_weight = jnp.asarray(class_weight, dtype=jnp.float32).reshape(1, C)
    target2d = jnp.asarray(target, dtype=jnp.int32).reshape(B, 1)

    tb = block_rows if block_rows is not None else _choose_block_rows(B, C, logit.dtype)
    nb = pl.cdiv(B, tb)

    kernel = functools.partial(_focal_loss_kernel, gamma=float(gamma))

    per_row = pl.pallas_call(
        kernel,
        out_shape=jax.ShapeDtypeStruct((B, 1), jnp.float32),
        grid_spec=pltpu.PrefetchScalarGridSpec(
            num_scalar_prefetch=0,
            grid=(nb,),
            in_specs=[
                pl.BlockSpec((tb, C), lambda i: (i, 0)),    # logits tile
                pl.BlockSpec((tb, 1), lambda i: (i, 0)),    # targets tile
                pl.BlockSpec((1, C), lambda i: (0, 0)),     # class weights, resident
            ],
            out_specs=pl.BlockSpec((tb, 1), lambda i: (i, 0)),
        ),
        compiler_params=pltpu.CompilerParams(
            dimension_semantics=("parallel",),              # v7x: shard grid over both TCs
            vmem_limit_bytes=32 * 1024 * 1024,
        ),
    )(logit, target2d, class_weight)

    if size_average:
        # Per-row partials written by the (parallel) grid; tiny (B,) mean in XLA.
        return jnp.mean(per_row)
    return per_row                                          # (B, 1), as in the reference


def _reference_focal_loss(logit, target, class_weight=None, gamma=2, size_average=True):
    logit = jnp.asarray(logit, dtype=jnp.float32)
    B, C = logit.shape
    if class_weight is None:
        class_weight = jnp.ones((C,), dtype=jnp.float32)
    class_weight = jnp.asarray(class_weight, dtype=jnp.float32)
    target = jnp.asarray(target)
    prob = jax.nn.softmax(logit, axis=1)
    sel = jax.nn.one_hot(target, C, dtype=jnp.float32)
    p_t = jnp.clip(jnp.sum(prob * sel, axis=1), 1e-8, 1.0 - 1e-8)
    w_t = class_weight[target]
    batch_loss = -w_t * (1.0 - p_t) ** gamma * jnp.log(p_t)
    return jnp.mean(batch_loss) if size_average else batch_loss.reshape(B, 1)


if __name__ == "__main__":
    key = jax.random.PRNGKey(0)
    k1, k2, k3, k4 = jax.random.split(key, 4)

    # Case 1: small softmax focal loss, mean over batch.
    B, C = 8, 32
    logit = jax.random.normal(k1, (B, C), dtype=jnp.float32) * 2.0
    target = jax.random.randint(k2, (B,), 0, C, dtype=jnp.int32)

    loss = jax.block_until_ready(focal_loss(logit, target, gamma=2, size_average=True))
    ref = _reference_focal_loss(logit, target, gamma=2, size_average=True)
    assert jnp.allclose(loss, ref, rtol=2e-5, atol=1e-6), (loss, ref)

    # Case 2: per-sample loss with class weights (size_average=False).
    cw = jax.random.uniform(k3, (C,), dtype=jnp.float32) + 0.5
    per = jax.block_until_ready(
        focal_loss(logit, target, cw, gamma=2, size_average=False))
    per_ref = _reference_focal_loss(logit, target, cw, gamma=2, size_average=False)
    assert per.shape == (B, 1)
    assert jnp.allclose(per, per_ref, rtol=2e-5, atol=1e-6), (per, per_ref)

    # Case 3: exercise batch tiling with a padded tail block (B not multiple of tile).
    B2 = 40
    logit2 = jax.random.normal(k4, (B2, C), dtype=jnp.float32) * 2.0
    target2 = jax.random.randint(k2, (B2,), 0, C, dtype=jnp.int32)
    loss2 = jax.block_until_ready(
        focal_loss(logit2, target2, gamma=2, size_average=True, block_rows=16))
    ref2 = _reference_focal_loss(logit2, target2, gamma=2, size_average=True)
    assert jnp.allclose(loss2, ref2, rtol=2e-5, atol=1e-6), (loss2, ref2)

    print("KERNEL_OK")
</pallas_src>

<mosaic_0001>
module attributes {stable_mosaic.version = 11 : i64} {
  func.func @_focal_loss_kernel(%arg0: i32, %arg1: memref<8x32xf32, #tpu.memory_space<vmem>>, %arg2: memref<8x1xi32, #tpu.memory_space<vmem>>, %arg3: memref<1x32xf32, #tpu.memory_space<vmem>>, %arg4: memref<8x1xf32, #tpu.memory_space<vmem>>) attributes {dimension_semantics = [#tpu.dimension_semantics<parallel>], iteration_bounds = array<i64: 1>, scalar_prefetch = 0 : i64, scratch_operands = 0 : i64, tpu.core_type = #tpu.core_type<tc>, window_params = [{transform_indices = @transform_0, window_bounds = array<i64: 8, 32>}, {transform_indices = @transform_1, window_bounds = array<i64: 8, 1>}, {pipeline_mode = #tpu.pipeline_mode<synchronous>, transform_indices = @transform_2, window_bounds = array<i64: 1, 32>}, {transform_indices = @transform_3, window_bounds = array<i64: 8, 1>}]} {
    %c0 = arith.constant 0 : index
    %c0_0 = arith.constant 0 : index
    %0 = vector.load %arg1[%c0, %c0_0] : memref<8x32xf32, #tpu.memory_space<vmem>>, vector<8x32xf32>
    %c0_1 = arith.constant 0 : index
    %c0_2 = arith.constant 0 : index
    %1 = vector.load %arg2[%c0_1, %c0_2] : memref<8x1xi32, #tpu.memory_space<vmem>>, vector<8x1xi32>
    %c0_3 = arith.constant 0 : index
    %c0_4 = arith.constant 0 : index
    %2 = vector.load %arg3[%c0_3, %c0_4] : memref<1x32xf32, #tpu.memory_space<vmem>>, vector<1x32xf32>
    %3 = tpu.iota {dimensions = array<i32: 1>} : vector<8x32xi32>
    %4 = vector.broadcast %1 : vector<8x1xi32> to vector<8x32xi32>
    %5 = arith.cmpi eq, %3, %4 : vector<8x32xi32>
    %6 = arith.extui %5 : vector<8x32xi1> to vector<8x32xi32>
    %7 = arith.sitofp %6 : vector<8x32xi32> to vector<8x32xf32>
    %cst = arith.constant dense<0xFF800000> : vector<8xf32>
    %8 = vector.multi_reduction <maximumf>, %0, %cst [1] : vector<8x32xf32> to vector<8xf32>
    %9 = vector.shape_cast %8 : vector<8xf32> to vector<8x1xf32>
    %10 = vector.broadcast %9 : vector<8x1xf32> to vector<8x32xf32>
    %11 = arith.subf %0, %10 : vector<8x32xf32>
    %12 = math.exp %11 : vector<8x32xf32>
    %cst_5 = arith.constant dense<0.000000e+00> : vector<8xf32>
    %13 = vector.multi_reduction <add>, %12, %cst_5 [1] : vector<8x32xf32> to vector<8xf32>
    %14 = vector.shape_cast %13 : vector<8xf32> to vector<8x1xf32>
    %15 = arith.mulf %11, %7 : vector<8x32xf32>
    %cst_6 = arith.constant dense<0.000000e+00> : vector<8xf32>
    %16 = vector.multi_reduction <add>, %15, %cst_6 [1] : vector<8x32xf32> to vector<8xf32>
    %17 = vector.shape_cast %16 : vector<8xf32> to vector<8x1xf32>
    %18 = math.log %14 : vector<8x1xf32>
    %19 = arith.subf %17, %18 : vector<8x1xf32>
    %cst_7 = arith.constant -18.420681 : f32
    %cst_8 = arith.constant -9.99999993E-9 : f32
    %20 = vector.broadcast %cst_7 : f32 to vector<8x1xf32>
    %21 = arith.maximumf %20, %19 : vector<8x1xf32>
    %22 = vector.broadcast %cst_8 : f32 to vector<8x1xf32>
    %23 = arith.minimumf %22, %21 : vector<8x1xf32>
    %24 = math.exp %23 : vector<8x1xf32>
    %25 = vector.broadcast %2 : vector<1x32xf32> to vector<8x32xf32>
    %26 = arith.mulf %25, %7 : vector<8x32xf32>
    %cst_9 = arith.constant dense<0.000000e+00> : vector<8xf32>
    %27 = vector.multi_reduction <add>, %26, %cst_9 [1] : vector<8x32xf32> to vector<8xf32>
    %28 = vector.shape_cast %27 : vector<8xf32> to vector<8x1xf32>
    %cst_10 = arith.constant 1.000000e+00 : f32
    %29 = vector.broadcast %cst_10 : f32 to vector<8x1xf32>
    %30 = arith.subf %29, %24 : vector<8x1xf32>
    %31 = arith.mulf %30, %30 : vector<8x1xf32>
    %cst_11 = arith.constant 0.000000e+00 : f32
    %32 = vector.broadcast %cst_11 : f32 to vector<8x1xf32>
    %33 = arith.subf %32, %28 : vector<8x1xf32>
    %34 = arith.mulf %33, %31 : vector<8x1xf32>
    %35 = arith.mulf %34, %23 : vector<8x1xf32>
    %c0_12 = arith.constant 0 : index
    %c0_13 = arith.constant 0 : index
    %36 = vector.load %arg4[%c0_12, %c0_13] : memref<8x1xf32, #tpu.memory_space<vmem>>, vector<8x1xf32>
    tpu.vector_store %arg4[%c0_12, %c0_13], %35 {strides = array<i32>} : memref<8x1xf32, #tpu.memory_space<vmem>>, vector<8x1xf32>,
    return
  }
  func.func @transform_0(%arg0: i32) -> (i32, i32) {
    %c0_i32 = arith.constant 0 : i32
    %c0_i32_0 = arith.constant 0 : i32
    return %arg0, %c0_i32 : i32, i32
  }
  func.func @transform_1(%arg0: i32) -> (i32, i32) {
    %c0_i32 = arith.constant 0 : i32
    %c0_i32_0 = arith.constant 0 : i32
    return %arg0, %c0_i32 : i32, i32
  }
  func.func @transform_2(%arg0: i32) -> (i32, i32) {
    %c0_i32 = arith.constant 0 : i32
    %c0_i32_0 = arith.constant 0 : i32
    %c0_i32_1 = arith.constant 0 : i32
    return %c0_i32, %c0_i32_0 : i32, i32
  }
  func.func @transform_3(%arg0: i32) -> (i32, i32) {
    %c0_i32 = arith.constant 0 : i32
    %c0_i32_0 = arith.constant 0 : i32
    return %arg0, %c0_i32 : i32, i32
  }
}

</mosaic_0001>

<bundles_post_ra>
// kernel: tpu_custom_call.1
= control target key start
LH: loop header
LB: loop body
LE: loop exit
PB: predicated region body
PF: predicated region fallthrough
CT: control target
= control target key end

     0   :  { %vm25_vm0 = vcmask 261120   ;;  %v78_v1 = vmov 0   ;;  %v17_v7 = vlaneseq  ;;  %v79_v10 = vmov 0.0   ;;  %s116_s0 = inlined_call_operand.vmem [shape: f32[8,32], index: 0, kind: input, shape index: {}]   ;;  %s117_s1 = inlined_call_operand.vmem [shape: s32[8,1], index: 1, kind: input, shape index: {}]   ;;  %s118_s2 = inlined_call_operand.vmem [shape: f32[1,32], index: 2, kind: input, shape index: {}]   ;;  %s119_s3 = inlined_call_operand.vmem [shape: f32[8,1], index: 3, kind: output, shape index: {}]  }
   0x1   :  { %v14_v0 = vld [vmem:[%s116_s0] sm:$0xff]  ;;  %71 = vset.pattern.permute.xlu0 %v78_v1  ;;  %vm61_vm2 = vcmask 7168  }
   0x2   :  { %v26_v2 = vsel %vm25_vm0, %v14_v0, -inf  ;;  %v15_v3 = vld [vmem:[%s117_s1] sm:$0xff]  ;;  %v18_v8 = vand.u32 127, %v17_v7 }
   0x3   :  { %27 = vmax.xlane.f32.xlu0 %v26_v2  ;;  %v68_v13 = vld [vmem:[%s118_s2] ss:$0 sm:$0xff] }
  0x19   :  { %20 = vperm.xlu0 %71, %v15_v3  }
  0x8c   :  { %v28_v4 = vpop.xlane.xlu0 %27 }
  0x8d   :  { %v29_v5 = vsub.f32 %v14_v0, %v28_v4 }
  0x8f   :  { %v30_v6 = vmul.f32 1.442695, %v29_v5 }
  0x91   :  { %72 = vpow2.f32 %v30_v6 }
  0x94   :  { %v21_v9 = vpop.permute.xlu0 %20 }
  0x95   :  { %vm22_vm1 = vcmp.eq.s32.totalorder %v18_v8, %v21_v9 }
  0x96   :  { %v67_v11 = vsel %vm22_vm1, 1.0, %v79_v10 }
  0x97   :  { %v35_v15 = vmul.f32 %v67_v11, %v29_v5  ;;  %v52_v16 = vmul.f32 %v68_v13, %v67_v11 }
  0x99   :  { %v36_v17 = vsel %vm25_vm0, %v35_v15, 0.0  ;;  %v53_v18 = vsel %vm25_vm0, %v52_v16, 0.0 }
  0x9e   :  { %v73_v12 = vpop.eup %72 }
  0x9f   :  { %v32_v14 = vsel %vm25_vm0, %v73_v12, 0.0 }
  0xa0   :  { %33 = vadd.xlane.f32.xlu1 %v32_v14 }
  0xa4   :  { %37 = vadd.xlane.f32.xlu1 %v36_v17 }
  0xa8   :  { %54 = vadd.xlane.f32.xlu1 %v53_v18 }
 0x129   :  { %v34_v19 = vpop.xlane.xlu1 %33 }
 0x12a   :  { %74 = vlog2.f32 %v34_v19 }
 0x12d   :  { %v38_v22 = vpop.xlane.xlu1 %37 }
 0x131   :  { %v55_v28 = vpop.xlane.xlu1 %54 }
 0x132   :  { %v58_v31 = vsub.f32 0.0, %v55_v28 }
 0x137   :  { %v75_v20 = vpop.eup %74 }
 0x138   :  { %v40_v21 = vmul.f32 0.6931472, %v75_v20 }
 0x13a   :  { %v41_v23 = vsub.f32 %v38_v22, %v40_v21 }
 0x13c   :  { %v42_v24 = vmax.f32 %v41_v23, -18.420681 }
 0x13e   :  { %v43_v25 = vmin.f32 %v42_v24, -1e-08 }
 0x140   :  { %v44_v26 = vmul.f32 1.442695, %v43_v25 }
 0x142   :  { %76 = vpow2.f32 %v44_v26 }
 0x14f   :  { %v77_v27 = vpop.eup %76 }
 0x150   :  { %v56_v29 = vsub.f32 1.0, %v77_v27 }
 0x152   :  { %v57_v30 = vmul.f32 %v56_v29, %v56_v29 }
 0x154   :  { %v59_v32 = vmul.f32 %v58_v31, %v57_v30 }
 0x156   :  { %v60_v33 = vmul.f32 %v59_v32, %v43_v25 }
 0x158   :  { %62 = vst.msk [vmem:[%s119_s3] sm:$0xff] %vm61_vm2, %v60_v33 }

</bundles_post_ra>
